<compile_context>
chip_gen: v7x
topology: tpu7x:2x2x1
jax: 0.10.0
libtpu: 0.0.40
codegen_flags: <defaults>
</compile_context>

<pallas_src>
import jax
import jax.numpy as jnp
from jax import lax
from jax.experimental import pallas as pl
from jax.experimental.pallas import tpu as pltpu

EMBED_IN, EMBED_OUT = 2, 32
W_IN, W_OUT = 66, 128
PT_DIM = W_IN - 2 * EMBED_OUT  # = 2
X_ROWS = 8                     # augmented feature rows (b, d, 1, 0*5)
CHUNK_N = 256                  # lanes processed per inner-loop step
TILE_N = 2048                  # nodes per grid step (multiple of CHUNK_N)


def _round_up(n, m):
    return ((n + m - 1) // m) * m


def agent_net_kernel(x_ref, m_ref, v_ref, o_ref):
    """One tile of TN nodes, feature-major (node axis on lanes).

    x_ref : [8, TN]   augmented features: rows (b, d, 1, 0, 0, 0, 0, 0)
    m_ref : [128, 8]  M_aug: col0/1 = wh@A, col2 = folded bias,
                      m_ref[0, 3] = V bias (multiplies the zero x-row 3)
    v_ref : [8, 128]  row 0 = V weights, rows 1..7 zero
    o_ref : [1, TN]   sigmoid(V(tanh(W(...))))  -- lane-dense store
    """
    m = m_ref[...]                                   # [128, 8]   resident
    v = v_ref[...]                                   # [8, 128]   resident
    vb = m_ref[0:1, 3:4]                             # [1, 1]     V bias
    n_chunks = o_ref.shape[1] // CHUNK_N

    def chunk(c, carry):
        off = c * CHUNK_N
        if not isinstance(off, int):                 # traced index from fori
            off = pl.multiple_of(off, CHUNK_N)
        xc = x_ref[:, pl.ds(off, CHUNK_N)]           # [8, C]
        # Single fused MXU matmul: embed + normalization + W + bias all folded.
        z = jnp.tanh(jnp.dot(m, xc, preferred_element_type=jnp.float32))  # [128, C]
        # V projection on the (idle) MXU; only row 0 of the result is real.
        s = jnp.dot(v, z, preferred_element_type=jnp.float32)             # [8, C]
        o_ref[:, pl.ds(off, CHUNK_N)] = jax.nn.sigmoid(s[0:1, :] + vb)
        return carry

    lax.fori_loop(0, n_chunks, chunk, 0, unroll=True)


def agent_net_forward(x_raw, pt_sc, params, *, tile_n=TILE_N):
    """x_raw: [N, 2] raw (b, d) pairs; pt_sc: [2]; returns prob [N, 1]."""
    assert tile_n % CHUNK_N == 0
    x_raw = x_raw.astype(jnp.float32)
    pt_f = pt_sc.astype(jnp.float32)
    n = x_raw.shape[0]

    ew, eb = params["embed_w"], params["embed_b"]             # [32,2], [32]
    ww, wb = params["W_w"], params["W_b"]                     # [128,66], [128]
    vw, vb = params["V_w"], params["V_b"]                     # [1,128], [1]

    # ---- global node statistics (cheap O(N*2) streaming reductions) ----
    cmin = jnp.min(x_raw, axis=0)                             # [2]
    cmax = jnp.max(x_raw, axis=0)                             # [2]
    xbar = jnp.mean(x_raw, axis=0)                            # [2]
    inv_r = 1.0 / (cmax - cmin)                               # hoisted reciprocal

    # ---- fold normalization into embed:  h = A x + c ----
    a_mat = ew * inv_r[None, :]                               # [32, 2]
    c_vec = eb - a_mat @ cmin                                 # [32]
    hg = a_mat @ xbar + c_vec                                 # [32] mean embedding
    wh = ww[:, :EMBED_OUT]                                    # [128, 32]
    wg = ww[:, EMBED_OUT:2 * EMBED_OUT]                       # [128, 32]
    wp = ww[:, 2 * EMBED_OUT:]                                # [128, 2]

    # ---- fold embed into W:  pre-tanh = M @ x_i + b ----
    m_mat = wh @ a_mat                                        # [128, 2]
    b_vec = wh @ c_vec + wb + wg @ hg + wp @ pt_f             # [128]

    # ---- pack operands (concatenate/pad, no chained scatter updates) ----
    vb_col = jnp.pad(vb.reshape(1, 1), ((0, W_OUT - 1), (0, 0)))          # [128,1]
    m_aug = jnp.concatenate(
        [m_mat, b_vec[:, None], vb_col,
         jnp.zeros((W_OUT, X_ROWS - 4), jnp.float32)], axis=1)            # [128, 8]
    v_aug = jnp.pad(vw, ((0, X_ROWS - 1), (0, 0)))                        # [8, 128]

    # ---- tile sizing: lane-dense node axis, >=2 grid steps when possible ----
    n_ceil = _round_up(n, CHUNK_N)
    half = _round_up((n_ceil + 1) // 2, CHUNK_N)   # keep 2+ tiles for v7x's 2 TCs
    tn = max(CHUNK_N, min(tile_n, half))
    n_pad = _round_up(n, tn)

    # augmented feature slab: rows (b, d, 1, 0...)
    x_body = jnp.pad(x_raw.T, ((0, 0), (0, n_pad - n)))                   # [2, n_pad]
    x_aug = jnp.concatenate(
        [x_body, jnp.ones((1, n_pad), jnp.float32),
         jnp.zeros((X_ROWS - 3, n_pad), jnp.float32)], axis=0)            # [8, n_pad]

    out = pl.pallas_call(
        agent_net_kernel,
        out_shape=jax.ShapeDtypeStruct((1, n_pad), jnp.float32),
        grid_spec=pltpu.PrefetchScalarGridSpec(
            num_scalar_prefetch=0,
            grid=(n_pad // tn,),
            in_specs=[
                pl.BlockSpec((X_ROWS, tn), lambda t: (0, t)),       # node tile
                pl.BlockSpec((W_OUT, X_ROWS), lambda t: (0, 0)),    # M_aug (resident)
                pl.BlockSpec((X_ROWS, W_OUT), lambda t: (0, 0)),    # V_aug (resident)
            ],
            out_specs=pl.BlockSpec((1, tn), lambda t: (0, t)),
        ),
        compiler_params=pltpu.CompilerParams(
            dimension_semantics=("parallel",)),  # independent node tiles
    )(x_aug, m_aug, v_aug)

    return out[0, :n].reshape(n, 1)


def init_params(key):
    """Deterministic init mimicking nn.Linear default (uniform +-1/sqrt(fan_in))."""
    ks = jax.random.split(key, 6)

    def lin(kw, kb, fan_in, fan_out):
        bound = 1.0 / jnp.sqrt(jnp.float32(fan_in))
        w = jax.random.uniform(kw, (fan_out, fan_in), jnp.float32, -bound, bound)
        b = jax.random.uniform(kb, (fan_out,), jnp.float32, -bound, bound)
        return w, b

    embed_w, embed_b = lin(ks[0], ks[1], EMBED_IN, EMBED_OUT)
    W_w, W_b = lin(ks[2], ks[3], W_IN, W_OUT)
    V_w, V_b = lin(ks[4], ks[5], W_OUT, 1)
    return dict(embed_w=embed_w, embed_b=embed_b, W_w=W_w, W_b=W_b, V_w=V_w, V_b=V_b)


def ref_forward(x_raw, pt_sc, params):
    """Pure-JAX reference mirroring the PyTorch forward."""
    cmin = x_raw.min(axis=0)
    cmax = x_raw.max(axis=0)
    xn = (x_raw - cmin) / (cmax - cmin)
    h = xn @ params["embed_w"].T + params["embed_b"]                 # [N, 32]
    hg = h.mean(axis=0)                                              # [32]
    hc = jnp.concatenate([hg, pt_sc], axis=0)                        # [34]
    inp = jnp.concatenate(
        [h, jnp.broadcast_to(hc, (x_raw.shape[0], hc.shape[0]))], axis=1)  # [N, 66]
    z = jnp.tanh(inp @ params["W_w"].T + params["W_b"])              # [N, 128]
    s = z @ params["V_w"].T + params["V_b"]                          # [N, 1]
    return jax.nn.sigmoid(s)


if __name__ == "__main__":
    key = jax.random.PRNGKey(0)
    k_params, k_x, k_pt = jax.random.split(key, 3)

    params = init_params(k_params)
    pt_sc = jax.random.uniform(k_pt, (PT_DIM,), jnp.float32, 0.0, 1.0)

    # Small case (typical node count), a 2-tile case exercising padding and the
    # parallel node-tile grid, and a multi-chunk / capped-tile case.
    for n_nodes in (8, 1000, 2500):
        kx = jax.random.fold_in(k_x, n_nodes)
        x_raw = jax.random.uniform(kx, (n_nodes, 2), jnp.float32, 0.5, 10.0)

        prob = agent_net_forward(x_raw, pt_sc, params)
        jax.block_until_ready(prob)

        expected = ref_forward(x_raw, pt_sc, params)
        assert prob.shape == (n_nodes, 1)
        max_err = float(jnp.max(jnp.abs(prob - expected)))
        assert jnp.allclose(prob, expected, atol=2e-5, rtol=2e-5), (
            f"mismatch at N={n_nodes}: max abs err {max_err}")

    print("KERNEL_OK")
</pallas_src>

<mosaic_0001>
module attributes {stable_mosaic.version = 11 : i64} {
  func.func @agent_net_kernel(%arg0: i32, %arg1: memref<8x256xf32, #tpu.memory_space<vmem>>, %arg2: memref<128x8xf32, #tpu.memory_space<vmem>>, %arg3: memref<8x128xf32, #tpu.memory_space<vmem>>, %arg4: memref<1x256xf32, #tpu.memory_space<vmem>>) attributes {dimension_semantics = [#tpu.dimension_semantics<parallel>], iteration_bounds = array<i64: 1>, scalar_prefetch = 0 : i64, scratch_operands = 0 : i64, tpu.core_type = #tpu.core_type<tc>, window_params = [{transform_indices = @transform_0, window_bounds = array<i64: 8, 256>}, {pipeline_mode = #tpu.pipeline_mode<synchronous>, transform_indices = @transform_1, window_bounds = array<i64: 128, 8>}, {pipeline_mode = #tpu.pipeline_mode<synchronous>, transform_indices = @transform_2, window_bounds = array<i64: 8, 128>}, {transform_indices = @transform_3, window_bounds = array<i64: 1, 256>}]} {
    %c0 = arith.constant 0 : index
    %c0_0 = arith.constant 0 : index
    %0 = vector.load %arg2[%c0, %c0_0] : memref<128x8xf32, #tpu.memory_space<vmem>>, vector<128x8xf32>
    %c0_1 = arith.constant 0 : index
    %c0_2 = arith.constant 0 : index
    %1 = vector.load %arg3[%c0_1, %c0_2] : memref<8x128xf32, #tpu.memory_space<vmem>>, vector<8x128xf32>
    %c0_3 = arith.constant 0 : index
    %c3 = arith.constant 3 : index
    %2 = vector.load %arg2[%c0_3, %c3] : memref<128x8xf32, #tpu.memory_space<vmem>>, vector<1x1xf32>
    %c0_i32 = arith.constant 0 : i32
    %c256_i32 = arith.constant 256 : i32
    %3 = arith.muli %c0_i32, %c256_i32 : i32
    %4 = tpu.assume_multiple %3, 256 : i32
    %c0_4 = arith.constant 0 : index
    %5 = arith.index_cast %4 : i32 to index
    %6 = vector.load %arg1[%c0_4, %5] : memref<8x256xf32, #tpu.memory_space<vmem>>, vector<8x256xf32>
    %cst = arith.constant dense<0.000000e+00> : vector<128x256xf32>
    %7 = tpu.matmul %0, %6, %cst {dimension_numbers = #tpu.dot_dimension_numbers<[1], [0], [0], [1], [0, 0, 1, 1], [], []>} : vector<128x8xf32>, vector<8x256xf32>, vector<128x256xf32> -> vector<128x256xf32>
    %8 = math.tanh %7 : vector<128x256xf32>
    %cst_5 = arith.constant dense<0.000000e+00> : vector<8x256xf32>
    %9 = tpu.matmul %1, %8, %cst_5 {dimension_numbers = #tpu.dot_dimension_numbers<[1], [0], [0], [1], [0, 0, 1, 1], [], []>} : vector<8x128xf32>, vector<128x256xf32>, vector<8x256xf32> -> vector<8x256xf32>
    %10 = vector.extract_strided_slice %9 {offsets = [0, 0], sizes = [1, 256], strides = [1, 1]} : vector<8x256xf32> to vector<1x256xf32>
    %11 = vector.broadcast %2 : vector<1x1xf32> to vector<1x256xf32>
    %12 = arith.addf %10, %11 : vector<1x256xf32>
    %13 = arith.negf %12 : vector<1x256xf32>
    %14 = math.exp %13 : vector<1x256xf32>
    %cst_6 = arith.constant 1.000000e+00 : f32
    %15 = vector.broadcast %cst_6 : f32 to vector<1x256xf32>
    %16 = arith.addf %15, %14 : vector<1x256xf32>
    %17 = arith.divf %15, %16 : vector<1x256xf32>
    %c0_7 = arith.constant 0 : index
    %18 = arith.index_cast %4 : i32 to index
    %19 = vector.load %arg4[%c0_7, %18] : memref<1x256xf32, #tpu.memory_space<vmem>>, vector<1x256xf32>
    tpu.vector_store %arg4[%c0_7, %18], %17 {strides = array<i32>} : memref<1x256xf32, #tpu.memory_space<vmem>>, vector<1x256xf32>,
    %c1_i32 = arith.constant 1 : i32
    return
  }
  func.func @transform_0(%arg0: i32) -> (i32, i32) {
    %c0_i32 = arith.constant 0 : i32
    %c0_i32_0 = arith.constant 0 : i32
    return %c0_i32, %arg0 : i32, i32
  }
  func.func @transform_1(%arg0: i32) -> (i32, i32) {
    %c0_i32 = arith.constant 0 : i32
    %c0_i32_0 = arith.constant 0 : i32
    %c0_i32_1 = arith.constant 0 : i32
    return %c0_i32, %c0_i32_0 : i32, i32
  }
  func.func @transform_2(%arg0: i32) -> (i32, i32) {
    %c0_i32 = arith.constant 0 : i32
    %c0_i32_0 = arith.constant 0 : i32
    %c0_i32_1 = arith.constant 0 : i32
    return %c0_i32, %c0_i32_0 : i32, i32
  }
  func.func @transform_3(%arg0: i32) -> (i32, i32) {
    %c0_i32 = arith.constant 0 : i32
    %c0_i32_0 = arith.constant 0 : i32
    return %c0_i32, %arg0 : i32, i32
  }
}

</mosaic_0001>

<bundles_post_ra>
// kernel: tpu_custom_call.1
= control target key start
LH: loop header
LB: loop body
LE: loop exit
PB: predicated region body
PF: predicated region fallthrough
CT: control target
= control target key end

     0   :  { %vm35_vm0 = vcmask 64512   ;;  %v555_v3 = vmov 0.0   ;;  %s667_s0 = inlined_call_operand.vmem [shape: f32[8,256], index: 0, kind: input, shape index: {}]   ;;  %s668_s1 = inlined_call_operand.vmem [shape: f32[128,8], index: 1, kind: input, shape index: {}]   ;;  %s669_s2 = inlined_call_operand.vmem [shape: f32[8,128], index: 2, kind: input, shape index: {}]   ;;  %s670_s3 = inlined_call_operand.hbm [shape: f32[1,256], index: 3, kind: output, shape index: {}]  }
   0x1   :  { %v34_v0 = vld [vmem:[%s667_s0 + $0x8] sm:$0xff]  ;;  %v33_v1 = vld [vmem:[%s667_s0] sm:$0xff]  ;;  %148 = vmatprep.mubr.f32.mxu0 %v555_v3  ;;  %341 = vmatprep.mubr.f32.mxu1 %v555_v3 }
   0x2   :  { %v15_v2 = vld [vmem:[%s668_s1] sm:$0xff]  ;;  %84 = vmatprep.subr.mxu0 %v34_v0  ;;  %v16_v4 = vld [vmem:[%s668_s1 + $0x8] sm:$0xff] }
   0x3   :  { %85 = vmatpush1.msra.mxu0 %v33_v1 }
   0x4   :  { %404 = vmatmul.mubr.msk.f32.vlgmr.msra.gmra.mrb[0].mxu0 %vm35_vm0, %v15_v2 }
   0x5   :  { %154 = vmatprep.mubr.f32.mxu0 %v555_v3 }
   0x6   :  { %8 = vsyncpa [#allocation3], 0  ;;  %v17_v5 = vld [vmem:[%s668_s1 + $0x10] sm:$0xff]  ;;  %v18_v6 = vld [vmem:[%s668_s1 + $0x18] sm:$0xff]  ;;  %v556_v20 = vmov 3  }
   0x7   :  { %v19_v7 = vld [vmem:[%s668_s1 + $0x20] sm:$0xff]  ;;  %v20_v8 = vld [vmem:[%s668_s1 + $0x28] sm:$0xff]  ;;  %v21_v9 = vld [vmem:[%s668_s1 + $0x30] sm:$0xff]  ;;  %458 = vset.pattern.permute.xlu0 %v556_v20 }
   0x8   :  { %405 = vmatmul.mubr.msk.f32.gmra.mrb[2].mxu0 %vm35_vm0, %v16_v4  ;;  %v22_v10 = vld [vmem:[%s668_s1 + $0x38] sm:$0xff]  ;;  %v23_v11 = vld [vmem:[%s668_s1 + $0x40] sm:$0xff]  ;;  %v24_v12 = vld [vmem:[%s668_s1 + $0x48] sm:$0xff] }
   0x9   :  { %160 = vmatprep.mubr.f32.mxu0 %v555_v3  ;;  %v25_v13 = vld [vmem:[%s668_s1 + $0x50] sm:$0xff]  ;;  %v26_v14 = vld [vmem:[%s668_s1 + $0x58] sm:$0xff]  ;;  %v27_v15 = vld [vmem:[%s668_s1 + $0x60] sm:$0xff] }
   0xa   :  { %v28_v16 = vld [vmem:[%s668_s1 + $0x68] sm:$0xff]  ;;  %v29_v17 = vld [vmem:[%s668_s1 + $0x70] sm:$0xff]  ;;  %v30_v18 = vld [vmem:[%s668_s1 + $0x78] sm:$0xff] }
   0xb   :  { %v32_v19 = vld [vmem:[%s668_s1] sm:$0x1] }
   0xc   :  { %406 = vmatmul.mubr.msk.f32.gmra.mrb[4].mxu0 %vm35_vm0, %v17_v5  ;;  %350 = vperm.xlu0 %458, %v32_v19  }
   0xd   :  { %166 = vmatprep.mubr.f32.mxu0 %v555_v3 }
  0x10   :  { %407 = vmatmul.mubr.msk.f32.gmra.mrb[6].mxu0 %vm35_vm0, %v18_v6 }
  0x11   :  { %172 = vmatprep.mubr.f32.mxu0 %v555_v3 }
  0x14   :  { %408 = vmatmul.mubr.msk.f32.gmra.mrb[8].mxu0 %vm35_vm0, %v19_v7 }
  0x15   :  { %178 = vmatprep.mubr.f32.mxu0 %v555_v3 }
  0x18   :  { %409 = vmatmul.mubr.msk.f32.gmra.mrb[10].mxu0 %vm35_vm0, %v20_v8 }
  0x19   :  { %184 = vmatprep.mubr.f32.mxu0 %v555_v3 }
  0x1c   :  { %410 = vmatmul.mubr.msk.f32.gmra.mrb[12].mxu0 %vm35_vm0, %v21_v9 }
  0x1d   :  { %190 = vmatprep.mubr.f32.mxu0 %v555_v3 }
  0x20   :  { %411 = vmatmul.mubr.msk.f32.gmra.mrb[14].mxu0 %vm35_vm0, %v22_v10 }
  0x21   :  { %196 = vmatprep.mubr.f32.mxu0 %v555_v3 }
  0x24   :  { %412 = vmatmul.mubr.msk.f32.gmra.mrb[16].mxu0 %vm35_vm0, %v23_v11 }
  0x25   :  { %202 = vmatprep.mubr.f32.mxu0 %v555_v3 }
  0x28   :  { %413 = vmatmul.mubr.msk.f32.gmra.mrb[18].mxu0 %vm35_vm0, %v24_v12 }
  0x29   :  { %208 = vmatprep.mubr.f32.mxu0 %v555_v3 }
  0x2c   :  { %414 = vmatmul.mubr.msk.f32.gmra.mrb[20].mxu0 %vm35_vm0, %v25_v13 }
  0x2d   :  { %214 = vmatprep.mubr.f32.mxu0 %v555_v3 }
  0x30   :  { %415 = vmatmul.mubr.msk.f32.gmra.mrb[22].mxu0 %vm35_vm0, %v26_v14 }
  0x31   :  { %220 = vmatprep.mubr.f32.mxu0 %v555_v3 }
  0x34   :  { %416 = vmatmul.mubr.msk.f32.gmra.mrb[24].mxu0 %vm35_vm0, %v27_v15 }
  0x35   :  { %226 = vmatprep.mubr.f32.mxu0 %v555_v3 }
  0x38   :  { %417 = vmatmul.mubr.msk.f32.gmra.mrb[26].mxu0 %vm35_vm0, %v28_v16 }
  0x39   :  { %232 = vmatprep.mubr.f32.mxu0 %v555_v3 }
  0x3c   :  { %418 = vmatmul.mubr.msk.f32.gmra.mrb[28].mxu0 %vm35_vm0, %v29_v17 }
  0x3d   :  { %238 = vmatprep.mubr.f32.mxu0 %v555_v3 }
  0x40   :  { %419 = vmatmul.mubr.msk.f32.gmra.mrb[30].mxu0 %vm35_vm0, %v30_v18 }
  0xd7   :  { %v150_v21 = vpop.f32.mrb[0].mxu0 }
  0xd8   :  { %v152_v22 = vpop.f32.mrb[1].mxu0  ;;  %459 = vtanh.f32 %v150_v21 }
  0xd9   :  { %461 = vtanh.f32 %v152_v22 }
  0xdb   :  { %v156_v23 = vpop.f32.mrb[2].mxu0 }
  0xdc   :  { %463 = vtanh.f32 %v156_v23  ;;  %v158_v24 = vpop.f32.mrb[3].mxu0 }
  0xdd   :  { %465 = vtanh.f32 %v158_v24 }
  0xdf   :  { %v162_v25 = vpop.f32.mrb[4].mxu0 }
  0xe0   :  { %v164_v26 = vpop.f32.mrb[5].mxu0  ;;  %467 = vtanh.f32 %v162_v25 }
  0xe1   :  { %469 = vtanh.f32 %v164_v26 }
  0xe2   :  { %v460_v28 = vpop.eup %459 }
  0xe3   :  { %v168_v27 = vpop.f32.mrb[6].mxu0  ;;  %v462_v30 = vpop.eup %461 }
  0xe4   :  { %471 = vtanh.f32 %v168_v27  ;;  %v170_v29 = vpop.f32.mrb[7].mxu0 }
  0xe5   :  { %473 = vtanh.f32 %v170_v29 }
  0xe6   :  { %v464_v31 = vpop.eup %463 }
  0xe7   :  { %v466_v32 = vpop.eup %465  ;;  %v174_v33 = vpop.f32.mrb[8].mxu0  ;;  %v424_v34 = vpack.c.bf16 %v464_v31, %v460_v28 }
  0xe8   :  { %v176_v35 = vpop.f32.mrb[9].mxu0  ;;  %v422_v36 = vpack.c.bf16 %v466_v32, %v462_v30  ;;  %475 = vtanh.f32 %v174_v33 }
  0xe9   :  { %477 = vtanh.f32 %v176_v35 }
  0xea   :  { %423 = vmatprep.subr.bf16.mxu1 %v422_v36  ;;  %v468_v38 = vpop.eup %467 }
  0xeb   :  { %v180_v37 = vpop.f32.mrb[10].mxu0  ;;  %425 = vmatpush1.bf16.msra.mxu1 %v424_v34  ;;  %v470_v40 = vpop.eup %469 }
  0xec   :  { %479 = vtanh.f32 %v180_v37  ;;  %v182_v39 = vpop.f32.mrb[11].mxu0  ;;  %v31_v37 = vld [vmem:[%s669_s2] sm:$0xff]  ;;  %s558_s2 = smov [#allocation2]  }
  0xed   :  { %481 = vtanh.f32 %v182_v39  ;;  %s396_s22 = sshll.u32 %s558_s2, 4  ;;  %s397_s22 = int_to_ptr.vmem [resolvable:$true] %s396_s22 }
  0xee   :  { %v472_v41 = vpop.eup %471  ;;  %s531_s23 = scalar_lea.vmem %s397_s22, 32  ;;  %p536_p1 = scmp.lt.s32.totalorder %s397_s22, %s397_s22 }
  0xef   :  { %v474_v42 = vpop.eup %473  ;;  %v186_v43 = vpop.f32.mrb[12].mxu0  ;;  %v428_v44 = vpack.c.bf16 %v472_v41, %v468_v38  ;;  %p532_p0 = scmp.ne.s32.totalorder %s397_s22, %s531_s23  ;;  %p537_p2 = scmp.lt.s32.totalorder %s531_s23, %s531_s23 }
  0xf0   :  { %v188_v45 = vpop.f32.mrb[13].mxu0  ;;  %v426_v46 = vpack.c.bf16 %v474_v42, %v470_v40  ;;  %483 = vtanh.f32 %v186_v43  ;;  %v351_v38 = vpop.permute.xlu0 %350 }
  0xf1   :  { %485 = vtanh.f32 %v188_v45  ;;  %p538_p3 = por %p537_p2, %p536_p1 }
  0xf2   :  { %427 = vmatprep.subr.bf16.mxu1 %v426_v46  ;;  %v476_v48 = vpop.eup %475 }
  0xf3   :  { %v192_v47 = vpop.f32.mrb[14].mxu0  ;;  %429 = vmatpush1.bf16.msra.mxu1 %v428_v44  ;;  %v478_v50 = vpop.eup %477  ;;  %p539_p4 = pnand %p538_p3, %p532_p0 }
  0xf4   :  { %487 = vtanh.f32 %v192_v47  ;;  %v194_v49 = vpop.f32.mrb[15].mxu0 }
  0xf5   :  { %489 = vtanh.f32 %v194_v49  ;;  %v557_v49 = vmov 1966171168  }
  0xf6   :  { %v480_v51 = vpop.eup %479 }
  0xf7   :  { %v482_v52 = vpop.eup %481  ;;  %v198_v53 = vpop.f32.mrb[16].mxu0  ;;  %v432_v54 = vpack.c.bf16 %v480_v51, %v476_v48  ;;  %v373_v51 = vlaneseq }
  0xf8   :  { %v200_v55 = vpop.f32.mrb[17].mxu0  ;;  %v430_v56 = vpack.c.bf16 %v482_v52, %v478_v50  ;;  %491 = vtanh.f32 %v198_v53  ;;  %v371_v50 = vunpack.c.l.s4 %v557_v49 }
  0xf9   :  { %493 = vtanh.f32 %v200_v55  ;;  %v374_v53 = vshrl.u32 %v373_v51, 7  ;;  %vm387_vm1 = vcmp.lt.s32.totalorder %v373_v51, 256 }
  0xfa   :  { %431 = vmatprep.subr.bf16.mxu1 %v430_v56  ;;  %v484_v58 = vpop.eup %483  ;;  %v372_v52 = vunpack.c.0.s8 %v371_v50 }
  0xfb   :  { %v204_v57 = vpop.f32.mrb[18].mxu0  ;;  %433 = vmatpush1.bf16.msra.mxu1 %v432_v54  ;;  %v486_v60 = vpop.eup %485 }
  0xfc   :  { %495 = vtanh.f32 %v204_v57  ;;  %v206_v59 = vpop.f32.mrb[19].mxu0  ;;  %v375_v55 = vsub.s32 %v372_v52, %v374_v53 }
  0xfd   :  { %497 = vtanh.f32 %v206_v59 }
  0xfe   :  { %v488_v61 = vpop.eup %487 }
  0xff   :  { %v490_v62 = vpop.eup %489  ;;  %v210_v63 = vpop.f32.mrb[20].mxu0  ;;  %v436_v0 = vpack.c.bf16 %v488_v61, %v484_v58 }
 0x100   :  { %v212_v1 = vpop.f32.mrb[21].mxu0  ;;  %v434_v2 = vpack.c.bf16 %v490_v62, %v486_v60  ;;  %499 = vtanh.f32 %v210_v63 }
 0x101   :  { %501 = vtanh.f32 %v212_v1 }
 0x102   :  { %435 = vmatprep.subr.bf16.mxu1 %v434_v2  ;;  %v492_v4 = vpop.eup %491 }
 0x103   :  { %v216_v3 = vpop.f32.mrb[22].mxu0  ;;  %437 = vmatpush1.bf16.msra.mxu1 %v436_v0  ;;  %v494_v6 = vpop.eup %493 }
 0x104   :  { %503 = vtanh.f32 %v216_v3  ;;  %v218_v5 = vpop.f32.mrb[23].mxu0 }
 0x105   :  { %505 = vtanh.f32 %v218_v5 }
 0x106   :  { %v496_v7 = vpop.eup %495 }
 0x107   :  { %v498_v8 = vpop.eup %497  ;;  %v222_v9 = vpop.f32.mrb[24].mxu0  ;;  %v440_v10 = vpack.c.bf16 %v496_v7, %v492_v4 }
 0x108   :  { %v224_v11 = vpop.f32.mrb[25].mxu0  ;;  %v438_v12 = vpack.c.bf16 %v498_v8, %v494_v6  ;;  %507 = vtanh.f32 %v222_v9 }
 0x109   :  { %509 = vtanh.f32 %v224_v11 }
 0x10a   :  { %439 = vmatprep.subr.bf16.mxu1 %v438_v12  ;;  %v500_v14 = vpop.eup %499 }
 0x10b   :  { %v228_v13 = vpop.f32.mrb[26].mxu0  ;;  %441 = vmatpush1.bf16.msra.mxu1 %v440_v10  ;;  %v502_v16 = vpop.eup %501 }
 0x10c   :  { %511 = vtanh.f32 %v228_v13  ;;  %v230_v15 = vpop.f32.mrb[27].mxu0 }
 0x10d   :  { %513 = vtanh.f32 %v230_v15 }
 0x10e   :  { %v504_v17 = vpop.eup %503 }
 0x10f   :  { %v506_v18 = vpop.eup %505  ;;  %v234_v19 = vpop.f32.mrb[28].mxu0  ;;  %v444_v20 = vpack.c.bf16 %v504_v17, %v500_v14 }
 0x110   :  { %v236_v21 = vpop.f32.mrb[29].mxu0  ;;  %v442_v22 = vpack.c.bf16 %v506_v18, %v502_v16  ;;  %515 = vtanh.f32 %v234_v19 }
 0x111   :  { %517 = vtanh.f32 %v236_v21 }
 0x112   :  { %443 = vmatprep.subr.bf16.mxu1 %v442_v22  ;;  %v508_v24 = vpop.eup %507 }
 0x113   :  { %v240_v23 = vpop.f32.mrb[30].mxu0  ;;  %445 = vmatpush1.bf16.msra.mxu1 %v444_v20  ;;  %v510_v26 = vpop.eup %509 }
 0x114   :  { %519 = vtanh.f32 %v240_v23  ;;  %v242_v25 = vpop.f32.mrb[31].mxu0 }
 0x115   :  { %521 = vtanh.f32 %v242_v25 }
 0x116   :  { %v512_v27 = vpop.eup %511 }
 0x117   :  { %v514_v28 = vpop.eup %513  ;;  %v448_v29 = vpack.c.bf16 %v512_v27, %v508_v24 }
 0x118   :  { %v446_v30 = vpack.c.bf16 %v514_v28, %v510_v26 }
 0x11a   :  { %447 = vmatprep.subr.bf16.mxu1 %v446_v30  ;;  %v516_v31 = vpop.eup %515 }
 0x11b   :  { %449 = vmatpush1.bf16.msra.mxu1 %v448_v29  ;;  %v518_v32 = vpop.eup %517 }
 0x11e   :  { %v520_v33 = vpop.eup %519 }
 0x11f   :  { %v522_v34 = vpop.eup %521  ;;  %v452_v35 = vpack.c.bf16 %v520_v33, %v516_v31 }
 0x120   :  { %v450_v36 = vpack.c.bf16 %v522_v34, %v518_v32 }
 0x122   :  { %451 = vmatprep.subr.bf16.mxu1 %v450_v36 }
 0x123   :  { %453 = vmatpush1.bf16.msra.mxu1 %v452_v35 }
 0x126   :  { %342 = vmatmul.mubr.f32.vlgmr.msra.gmra.mrb[0].mxu1 %v31_v37 }
 0x1f9   :  { %v343_v39 = vpop.f32.mrb[0].mxu1 }
 0x1fa   :  { %v353_v40 = vadd.f32 %v351_v38, %v343_v39  ;;  %v345_v41 = vpop.f32.mrb[1].mxu1 }
 0x1fb   :  { %v354_v42 = vadd.f32 %v351_v38, %v345_v41 }
 0x1fc   :  { %v420_v43 = vmul.f32 -1.442695, %v353_v40 }
 0x1fd   :  { %v421_v44 = vmul.f32 -1.442695, %v354_v42 }
 0x1fe   :  { %523 = vpow2.f32 %v420_v43 }
 0x1ff   :  { %525 = vpow2.f32 %v421_v44 }
 0x208   :  { %v524_v45 = vpop.eup %523 }
 0x209   :  { %v526_v46 = vpop.eup %525  ;;  %v361_v47 = vadd.f32 1.0, %v524_v45 }
 0x20a   :  { %v362_v48 = vadd.f32 1.0, %v526_v46 }
 0x20b   :  { %527 = vrcp.f32 %v361_v47 }
 0x20c   :  { %529 = vrcp.f32 %v362_v48 }
 0x215   :  { %v528_v54 = vpop.eup %527 }
 0x216   :  { %v530_v56 = vpop.eup %529 }
 0x217   :  { %v369_v57 = vcombine.low %v528_v54, %v530_v56 }
 0x219   :  { %v376_v58 = vrot.slane %v369_v57, %v375_v55 }
 0x21b   :  { %v383_v59 = vrot.slane %v376_v58, %v375_v55 }
 0x21d   :  { %389 = vst.msk [vmem:[#allocation2] sm:$0x3] %vm387_vm1, %v383_v59 }
 0x21e   :  { %542 = shalt.err (!%p539_p4)
}
 0x21f   :  { %s543_s26 = scalar_lea.hbm %s670_s3, 32 }
 0x220   :  { %p544_p5 = scmp.ne.s32.totalorder %s670_s3, %s543_s26  ;;  %p547_p6 = scmp.lt.u32.totalorder %s543_s26, %s670_s3 }
 0x222   :  { %p549_p7 = pnand %p547_p6, %p544_p5 }
 0x224   :  { %552 = shalt.err (!%p549_p7)
}
 0x225   :  { %399 = dma.vmem_to_hbm [thread:$0]  %s397_s22, 32, %s670_s3, [#allocation3]  }
 0x226   :  { %553 = dma.done.wait [#allocation3], 32  }
 0x227   :  { %554 = vsyncadd [#allocation3], 4294967264 }
 0x228   :  { %403 = vsyncpa [#allocation3], 1 }

</bundles_post_ra>
